<compile_context>
chip_gen: v6e
topology: v6e:2x2x1
jax: 0.10.0
libtpu: 0.0.40
codegen_flags: <defaults>
</compile_context>

<pallas_src>
import jax
import jax.numpy as jnp
from jax.experimental import pallas as pl
from jax.experimental.pallas import tpu as pltpu


def _birnn_kernel(x_ref, m_ref, h0_ref, wih_ref, whh_ref, b_ref,
                  out_ref, hcarry_ref):
    """One (direction d, time t) grid step of the masked Elman recurrence.

    x_ref      : (1, 1, B, D)  embedded input at time t for direction d
    m_ref      : (1, 1, B, 1)  float mask at time t
    h0_ref     : (1, B, H)     initial hidden state for direction d
    wih_ref    : (1, D, H)     input->hidden weight
    whh_ref    : (1, H, H)     hidden->hidden weight
    b_ref      : (1, 1, H)     bias
    out_ref    : (1, 1, B, H)  per-step output h_t
    hcarry_ref : (1, B, H)     resident carry (same block for all t) ->
                               final hidden state of direction d
    """
    t = pl.program_id(1)

    @pl.when(t == 0)
    def _():
        hcarry_ref[...] = h0_ref[...]

    h_prev = hcarry_ref[0]                               # (B, H)
    x_t = x_ref[0, 0]                                    # (B, D)
    m_t = m_ref[0, 0]                                    # (B, 1)

    pre = (jnp.dot(x_t, wih_ref[0], preferred_element_type=jnp.float32)
           + jnp.dot(h_prev, whh_ref[0], preferred_element_type=jnp.float32)
           + b_ref[0])                                   # (B, H)
    h_new = jnp.tanh(pre)                                # EUP
    h_t = m_t * h_new + (1.0 - m_t) * h_prev             # masked carry-through

    out_ref[0, 0] = h_t.astype(out_ref.dtype)
    hcarry_ref[0] = h_t


def bidirectional_rnn_forward(params, embedded, mask=None, hidden=None,
                              return_hidden=False):
    """Mirrors BiDirectionalRNN.forward.

    embedded: tuple (x_forward, x_backward), each [B, T, D]
    mask:     None, a single [B, T] array, or a tuple of two of them
    hidden:   required iff return_hidden=True; tuple of two [B, H] states
    returns:  outputs [B, T, 2H]  (and (h_fwd, h_bwd) if return_hidden)
    """
    assert isinstance(embedded, tuple)
    if not isinstance(mask, tuple):
        mask = (mask, mask)

    x_f, x_b = embedded
    B, T, D = x_f.shape
    H = params["w_hh"].shape[-1]

    masks = tuple(jnp.ones((B, T), jnp.float32) if m is None
                  else m.astype(jnp.float32) for m in mask)

    if return_hidden:
        assert hidden is not None and len(hidden) == 2
        h0 = jnp.stack([hidden[0], hidden[1]]).astype(jnp.float32)       # [2,B,H]
    else:
        h0 = jnp.zeros((2, B, H), jnp.float32)

    # direction-major, time-major layout: [2, T, B, *] (batch on sublanes,
    # hidden/feature on the 128-lane axis)
    x = jnp.stack([x_f, x_b]).astype(jnp.float32).transpose(0, 2, 1, 3)  # [2,T,B,D]
    m = jnp.stack(masks).transpose(0, 2, 1)[..., None]                   # [2,T,B,1]

    w_ih = params["w_ih"].astype(jnp.float32)                            # [2,D,H]
    w_hh = params["w_hh"].astype(jnp.float32)                            # [2,H,H]
    b = params["b"].reshape(2, 1, H).astype(jnp.float32)                 # [2,1,H]

    flops = 2 * T * (2 * B * D * H + 2 * B * H * H + 4 * B * H)
    transcendentals = 2 * T * B * H
    bytes_accessed = 4 * (x.size + m.size + h0.size + w_ih.size + w_hh.size
                          + b.size + 2 * T * B * H + 2 * B * H)

    outs, h_fin = pl.pallas_call(
        _birnn_kernel,
        out_shape=(jax.ShapeDtypeStruct((2, T, B, H), jnp.float32),
                   jax.ShapeDtypeStruct((2, B, H), jnp.float32)),
        grid_spec=pltpu.PrefetchScalarGridSpec(
            num_scalar_prefetch=0,
            grid=(2, T),
            in_specs=[
                pl.BlockSpec((1, 1, B, D), lambda d, t: (d, t, 0, 0)),   # x_t
                pl.BlockSpec((1, 1, B, 1), lambda d, t: (d, t, 0, 0)),   # mask_t
                pl.BlockSpec((1, B, H), lambda d, t: (d, 0, 0)),         # h0
                pl.BlockSpec((1, D, H), lambda d, t: (d, 0, 0)),         # W_ih
                pl.BlockSpec((1, H, H), lambda d, t: (d, 0, 0)),         # W_hh
                pl.BlockSpec((1, 1, H), lambda d, t: (d, 0, 0)),         # bias
            ],
            out_specs=[
                pl.BlockSpec((1, 1, B, H), lambda d, t: (d, t, 0, 0)),   # outputs
                pl.BlockSpec((1, B, H), lambda d, t: (d, 0, 0)),         # final h
            ],
        ),
        compiler_params=pltpu.CompilerParams(
            dimension_semantics=("parallel", "arbitrary")),
        cost_estimate=pl.CostEstimate(flops=flops,
                                      transcendentals=transcendentals,
                                      bytes_accessed=bytes_accessed),
    )(x, m, h0, w_ih, w_hh, b)

    outs = outs.transpose(0, 2, 1, 3)                          # [2, B, T, H]
    outputs = jnp.concatenate([outs[0], outs[1]], axis=-1)     # [B, T, 2H]
    if not return_hidden:
        return outputs
    return outputs, (h_fin[0], h_fin[1])


def _reference(params, embedded, masks, hidden):
    """Pure-JAX reference (lax.scan per direction)."""
    def run(x, msk, w_ih, w_hh, b, h0):
        def step(h, xm):
            xt, mt = xm
            hn = jnp.tanh(xt @ w_ih + h @ w_hh + b)
            h = mt[:, None] * hn + (1.0 - mt[:, None]) * h
            return h, h
        hT, hs = jax.lax.scan(step, h0,
                              (jnp.swapaxes(x, 0, 1), jnp.swapaxes(msk, 0, 1)))
        return jnp.swapaxes(hs, 0, 1), hT                      # [B,T,H], [B,H]

    of, hf = run(embedded[0], masks[0], params["w_ih"][0], params["w_hh"][0],
                 params["b"][0], hidden[0])
    ob, hb = run(embedded[1], masks[1], params["w_ih"][1], params["w_hh"][1],
                 params["b"][1], hidden[1])
    return jnp.concatenate([of, ob], axis=-1), (hf, hb)


if __name__ == "__main__":
    B, T, D, H = 2, 8, 32, 32
    key = jax.random.PRNGKey(0)
    k = jax.random.split(key, 8)

    params = {
        "w_ih": jax.random.normal(k[0], (2, D, H), jnp.float32) * 0.1,
        "w_hh": jax.random.normal(k[1], (2, H, H), jnp.float32) * 0.1,
        "b":    jax.random.normal(k[2], (2, H), jnp.float32) * 0.01,
    }

    # (forward_stream, backward_stream) embedded activations + per-direction masks
    x_fwd = jax.random.normal(k[3], (B, T, D), jnp.float32)
    x_bwd = jax.random.normal(k[4], (B, T, D), jnp.float32)
    mask_fwd = jnp.ones((B, T), jnp.float32).at[:, -1].set(0.0)
    mask_bwd = jnp.ones((B, T), jnp.float32).at[:, 0].set(0.0)
    h0_fwd = jax.random.normal(k[5], (B, H), jnp.float32) * 0.1
    h0_bwd = jax.random.normal(k[6], (B, H), jnp.float32) * 0.1

    # return_hidden=True path (hidden carry in + final hidden out)
    outputs, hid = bidirectional_rnn_forward(
        params, (x_fwd, x_bwd), mask=(mask_fwd, mask_bwd),
        hidden=(h0_fwd, h0_bwd), return_hidden=True)
    jax.block_until_ready((outputs, hid))

    ref_out, ref_hid = _reference(params, (x_fwd, x_bwd),
                                  (mask_fwd, mask_bwd), (h0_fwd, h0_bwd))
    assert outputs.shape == (B, T, 2 * H)
    assert jnp.allclose(outputs, ref_out, rtol=1e-4, atol=1e-4)
    assert jnp.allclose(hid[0], ref_hid[0], rtol=1e-4, atol=1e-4)
    assert jnp.allclose(hid[1], ref_hid[1], rtol=1e-4, atol=1e-4)

    # return_hidden=False path with a single shared mask (mirrors module logic)
    out2 = bidirectional_rnn_forward(params, (x_fwd, x_bwd), mask=mask_fwd,
                                     return_hidden=False)
    jax.block_until_ready(out2)
    assert out2.shape == (B, T, 2 * H)

    print("KERNEL_OK")
</pallas_src>

<mosaic_0001>
module attributes {stable_mosaic.version = 11 : i64} {
  func.func @_birnn_kernel(%arg0: i32, %arg1: i32, %arg2: memref<1x1x2x32xf32, #tpu.memory_space<vmem>>, %arg3: memref<1x1x2x1xf32, #tpu.memory_space<vmem>>, %arg4: memref<1x2x32xf32, #tpu.memory_space<vmem>>, %arg5: memref<1x32x32xf32, #tpu.memory_space<vmem>>, %arg6: memref<1x32x32xf32, #tpu.memory_space<vmem>>, %arg7: memref<1x1x32xf32, #tpu.memory_space<vmem>>, %arg8: memref<1x1x2x32xf32, #tpu.memory_space<vmem>>, %arg9: memref<1x2x32xf32, #tpu.memory_space<vmem>>) attributes {dimension_semantics = [#tpu.dimension_semantics<parallel>, #tpu.dimension_semantics<arbitrary>], iteration_bounds = array<i64: 2, 8>, scalar_prefetch = 0 : i64, scratch_operands = 0 : i64, tpu.core_type = #tpu.core_type<tc>, window_params = [{transform_indices = @transform_0, window_bounds = array<i64: 1, 1, 2, 32>}, {transform_indices = @transform_1, window_bounds = array<i64: 1, 1, 2, 1>}, {transform_indices = @transform_2, window_bounds = array<i64: 1, 2, 32>}, {transform_indices = @transform_3, window_bounds = array<i64: 1, 32, 32>}, {transform_indices = @transform_4, window_bounds = array<i64: 1, 32, 32>}, {transform_indices = @transform_5, window_bounds = array<i64: 1, 1, 32>}, {transform_indices = @transform_6, window_bounds = array<i64: 1, 1, 2, 32>}, {transform_indices = @transform_7, window_bounds = array<i64: 1, 2, 32>}]} {
    %c0_i32 = arith.constant 0 : i32
    %0 = arith.cmpi eq, %arg1, %c0_i32 : i32
    %1 = arith.extui %0 : i1 to i32
    %c0_i32_0 = arith.constant 0 : i32
    %2 = arith.cmpi ne, %1, %c0_i32_0 : i32
    scf.if %2 {
      %c0_29 = arith.constant 0 : index
      %c0_30 = arith.constant 0 : index
      %c0_31 = arith.constant 0 : index
      %34 = vector.load %arg4[%c0_29, %c0_30, %c0_31] : memref<1x2x32xf32, #tpu.memory_space<vmem>>, vector<1x2x32xf32>
      %c0_32 = arith.constant 0 : index
      %c0_33 = arith.constant 0 : index
      %c0_34 = arith.constant 0 : index
      %35 = vector.load %arg9[%c0_32, %c0_33, %c0_34] : memref<1x2x32xf32, #tpu.memory_space<vmem>>, vector<1x2x32xf32>
      tpu.vector_store %arg9[%c0_32, %c0_33, %c0_34], %34 {strides = array<i32>} : memref<1x2x32xf32, #tpu.memory_space<vmem>>, vector<1x2x32xf32>,
    } else {
    }
    %c0 = arith.constant 0 : index
    %c0_1 = arith.constant 0 : index
    %c0_2 = arith.constant 0 : index
    %3 = vector.load %arg9[%c0, %c0_1, %c0_2] : memref<1x2x32xf32, #tpu.memory_space<vmem>>, vector<1x2x32xf32>
    %4 = vector.shape_cast %3 : vector<1x2x32xf32> to vector<2x32xf32>
    %c0_3 = arith.constant 0 : index
    %c0_4 = arith.constant 0 : index
    %c0_5 = arith.constant 0 : index
    %c0_6 = arith.constant 0 : index
    %5 = vector.load %arg2[%c0_3, %c0_4, %c0_5, %c0_6] : memref<1x1x2x32xf32, #tpu.memory_space<vmem>>, vector<1x1x2x32xf32>
    %6 = vector.shape_cast %5 : vector<1x1x2x32xf32> to vector<2x32xf32>
    %c0_7 = arith.constant 0 : index
    %c0_8 = arith.constant 0 : index
    %c0_9 = arith.constant 0 : index
    %c0_10 = arith.constant 0 : index
    %7 = vector.load %arg3[%c0_7, %c0_8, %c0_9, %c0_10] : memref<1x1x2x1xf32, #tpu.memory_space<vmem>>, vector<1x1x2x1xf32>
    %8 = vector.shape_cast %7 : vector<1x1x2x1xf32> to vector<2x1xf32>
    %c0_11 = arith.constant 0 : index
    %c0_12 = arith.constant 0 : index
    %c0_13 = arith.constant 0 : index
    %9 = vector.load %arg5[%c0_11, %c0_12, %c0_13] : memref<1x32x32xf32, #tpu.memory_space<vmem>>, vector<1x32x32xf32>
    %10 = vector.shape_cast %9 : vector<1x32x32xf32> to vector<32x32xf32>
    %cst = arith.constant dense<0.000000e+00> : vector<2x32xf32>
    %11 = tpu.matmul %6, %10, %cst {dimension_numbers = #tpu.dot_dimension_numbers<[1], [0], [0], [1], [0, 0, 1, 1], [], []>} : vector<2x32xf32>, vector<32x32xf32>, vector<2x32xf32> -> vector<2x32xf32>
    %c0_14 = arith.constant 0 : index
    %c0_15 = arith.constant 0 : index
    %c0_16 = arith.constant 0 : index
    %12 = vector.load %arg6[%c0_14, %c0_15, %c0_16] : memref<1x32x32xf32, #tpu.memory_space<vmem>>, vector<1x32x32xf32>
    %13 = vector.shape_cast %12 : vector<1x32x32xf32> to vector<32x32xf32>
    %cst_17 = arith.constant dense<0.000000e+00> : vector<2x32xf32>
    %14 = tpu.matmul %4, %13, %cst_17 {dimension_numbers = #tpu.dot_dimension_numbers<[1], [0], [0], [1], [0, 0, 1, 1], [], []>} : vector<2x32xf32>, vector<32x32xf32>, vector<2x32xf32> -> vector<2x32xf32>
    %15 = arith.addf %11, %14 : vector<2x32xf32>
    %c0_18 = arith.constant 0 : index
    %c0_19 = arith.constant 0 : index
    %c0_20 = arith.constant 0 : index
    %16 = vector.load %arg7[%c0_18, %c0_19, %c0_20] : memref<1x1x32xf32, #tpu.memory_space<vmem>>, vector<1x1x32xf32>
    %17 = vector.shape_cast %16 : vector<1x1x32xf32> to vector<1x32xf32>
    %18 = vector.broadcast %17 : vector<1x32xf32> to vector<2x32xf32>
    %19 = arith.addf %15, %18 : vector<2x32xf32>
    %20 = math.tanh %19 : vector<2x32xf32>
    %21 = vector.broadcast %8 : vector<2x1xf32> to vector<2x32xf32>
    %22 = arith.mulf %21, %20 : vector<2x32xf32>
    %cst_21 = arith.constant 1.000000e+00 : f32
    %23 = vector.broadcast %cst_21 : f32 to vector<2x1xf32>
    %24 = arith.subf %23, %8 : vector<2x1xf32>
    %25 = vector.broadcast %24 : vector<2x1xf32> to vector<2x32xf32>
    %26 = arith.mulf %25, %4 : vector<2x32xf32>
    %27 = arith.addf %22, %26 : vector<2x32xf32>
    %c0_22 = arith.constant 0 : index
    %c0_23 = arith.constant 0 : index
    %c0_24 = arith.constant 0 : index
    %c0_25 = arith.constant 0 : index
    %28 = vector.load %arg8[%c0_22, %c0_23, %c0_24, %c0_25] : memref<1x1x2x32xf32, #tpu.memory_space<vmem>>, vector<1x1x2x32xf32>
    %29 = vector.shape_cast %28 : vector<1x1x2x32xf32> to vector<2x32xf32>
    %30 = vector.shape_cast %27 : vector<2x32xf32> to vector<1x1x2x32xf32>
    tpu.vector_store %arg8[%c0_22, %c0_23, %c0_24, %c0_25], %30 {strides = array<i32>} : memref<1x1x2x32xf32, #tpu.memory_space<vmem>>, vector<1x1x2x32xf32>,
    %c0_26 = arith.constant 0 : index
    %c0_27 = arith.constant 0 : index
    %c0_28 = arith.constant 0 : index
    %31 = vector.load %arg9[%c0_26, %c0_27, %c0_28] : memref<1x2x32xf32, #tpu.memory_space<vmem>>, vector<1x2x32xf32>
    %32 = vector.shape_cast %31 : vector<1x2x32xf32> to vector<2x32xf32>
    %33 = vector.shape_cast %27 : vector<2x32xf32> to vector<1x2x32xf32>
    tpu.vector_store %arg9[%c0_26, %c0_27, %c0_28], %33 {strides = array<i32>} : memref<1x2x32xf32, #tpu.memory_space<vmem>>, vector<1x2x32xf32>,
    return
  }
  func.func @transform_0(%arg0: i32, %arg1: i32) -> (i32, i32, i32, i32) {
    %c0_i32 = arith.constant 0 : i32
    %c0_i32_0 = arith.constant 0 : i32
    %c0_i32_1 = arith.constant 0 : i32
    return %arg0, %arg1, %c0_i32, %c0_i32_0 : i32, i32, i32, i32
  }
  func.func @transform_1(%arg0: i32, %arg1: i32) -> (i32, i32, i32, i32) {
    %c0_i32 = arith.constant 0 : i32
    %c0_i32_0 = arith.constant 0 : i32
    %c0_i32_1 = arith.constant 0 : i32
    return %arg0, %arg1, %c0_i32, %c0_i32_0 : i32, i32, i32, i32
  }
  func.func @transform_2(%arg0: i32, %arg1: i32) -> (i32, i32, i32) {
    %c0_i32 = arith.constant 0 : i32
    %c0_i32_0 = arith.constant 0 : i32
    %c0_i32_1 = arith.constant 0 : i32
    return %arg0, %c0_i32, %c0_i32_0 : i32, i32, i32
  }
  func.func @transform_3(%arg0: i32, %arg1: i32) -> (i32, i32, i32) {
    %c0_i32 = arith.constant 0 : i32
    %c0_i32_0 = arith.constant 0 : i32
    %c0_i32_1 = arith.constant 0 : i32
    return %arg0, %c0_i32, %c0_i32_0 : i32, i32, i32
  }
  func.func @transform_4(%arg0: i32, %arg1: i32) -> (i32, i32, i32) {
    %c0_i32 = arith.constant 0 : i32
    %c0_i32_0 = arith.constant 0 : i32
    %c0_i32_1 = arith.constant 0 : i32
    return %arg0, %c0_i32, %c0_i32_0 : i32, i32, i32
  }
  func.func @transform_5(%arg0: i32, %arg1: i32) -> (i32, i32, i32) {
    %c0_i32 = arith.constant 0 : i32
    %c0_i32_0 = arith.constant 0 : i32
    %c0_i32_1 = arith.constant 0 : i32
    return %arg0, %c0_i32, %c0_i32_0 : i32, i32, i32
  }
  func.func @transform_6(%arg0: i32, %arg1: i32) -> (i32, i32, i32, i32) {
    %c0_i32 = arith.constant 0 : i32
    %c0_i32_0 = arith.constant 0 : i32
    %c0_i32_1 = arith.constant 0 : i32
    return %arg0, %arg1, %c0_i32, %c0_i32_0 : i32, i32, i32, i32
  }
  func.func @transform_7(%arg0: i32, %arg1: i32) -> (i32, i32, i32) {
    %c0_i32 = arith.constant 0 : i32
    %c0_i32_0 = arith.constant 0 : i32
    %c0_i32_1 = arith.constant 0 : i32
    return %arg0, %c0_i32, %c0_i32_0 : i32, i32, i32
  }
}

</mosaic_0001>

<bundles_post_ra>
// kernel: tpu_custom_call.1
= control target key start
LH: loop header
LB: loop body
LE: loop exit
PB: predicated region body
PF: predicated region fallthrough
CT: control target
= control target key end

     0   :  { %s1668_s0 = inlined_call_operand.vmem [shape: f32[2,8,2,32], index: 0, kind: input, shape index: {}]   ;;  %s1669_s1 = inlined_call_operand.vmem [shape: f32[2,8,2,1], index: 1, kind: input, shape index: {}]   ;;  %s1670_s2 = inlined_call_operand.vmem [shape: f32[2,2,32], index: 2, kind: input, shape index: {}]   ;;  %s1671_s3 = inlined_call_operand.hbm [shape: f32[2,32,32], index: 3, kind: input, shape index: {}]   ;;  %s1672_s4 = inlined_call_operand.hbm [shape: f32[2,32,32], index: 4, kind: input, shape index: {}]   ;;  %s1673_s5 = inlined_call_operand.vmem [shape: f32[2,1,32], index: 5, kind: input, shape index: {}]   ;;  %s1674_s6 = inlined_call_operand.hbm [shape: f32[2,8,2,32], index: 6, kind: output, shape index: {0}]   ;;  %s1675_s7 = inlined_call_operand.hbm [shape: f32[2,2,32], index: 7, kind: output, shape index: {1}]  }
   0x1   :  { %1695 = sst [smem:[#allocation30_spill]] %s1671_s3 }
   0x2   :  { %1696 = sst [smem:[#allocation31_spill]] %s1672_s4 }
   0x3   :  { %1697 = sst [smem:[#allocation32_spill]] %s1675_s7 }
   0x4   :  { %13 = vsyncpa [#allocation3], 0 }
   0x5   :  { %15 = vsyncpa [#allocation3 + $0x1], 0 }
   0x6   :  { %16 = vsyncpa [#allocation6], 0 }
   0x7   :  { %18 = vsyncpa [#allocation6 + $0x1], 0 }
   0x8   :  { %19 = vsyncpa [#allocation4], 0 }
   0x9   :  { %21 = vsyncpa [#allocation4 + $0x1], 0 }
   0xa   :  { %22 = vsyncpa [#allocation9], 0 }
   0xb   :  { %24 = vsyncpa [#allocation9 + $0x1], 0  ;;  %s1321_s24 = smov 0   ;;  %s1323_s25 = smov 0  }
   0xc   :  { %s1325_s26 = smov 0   ;;  %s1327_s27 = smov 0  }
   0xd   :  { %s1329_s28 = smov 0   ;;  %s1331_s29 = smov 0  }
   0xe   :  { %s1333_s30 = smov 0   ;;  %s1335_s8 = smov 0  }
   0xf   :  { %s1337_s9 = smov 0   ;;  %s1339_s10 = smov 0  }
  0x10   :  { %s1341_s11 = smov 0  }
  0x11 LB: > { %1698 = sst [smem:[#allocation14_spill]] %s1230_s24  ;;  %s875_s12 = sadd.s32 4294967295, %s1270_s11   ;;  %s1270_s11 = sphi %s1341_s11, %s30_s11   ;;  %s1266_s10 = sphi %s1339_s10, %s1743_s10   ;;  %s1262_s9 = sphi %s1337_s9, %s1742_s9   ;;  %s1258_s8 = sphi %s1335_s8, %s1741_s8   ;;  %s1254_s30 = sphi %s1333_s30, %s1740_s30   ;;  %s1250_s29 = sphi %s1331_s29, %s1739_s29   ;;  %s1246_s28 = sphi %s1329_s28, %s1738_s28   ;;  %s1242_s27 = sphi %s1327_s27, %s1737_s27   ;;  %s1238_s26 = sphi %s1325_s26, %s1736_s26   ;;  %s1234_s25 = sphi %s1323_s25, %s1745_s25   ;;  %s1230_s24 = sphi %s1321_s24, %s1744_s24  }
  0x12   : > { %1699 = sst [smem:[#allocation15_spill]] %s1238_s26  ;;  %s876_s13 = sadd.s32 4294967294, %s1270_s11  }
  0x13   : > { %1700 = sst [smem:[#allocation16_spill]] %s1242_s27  ;;  %s39_s14 = sadd.s32 1, %s1262_s9 }
  0x14   : > { %1701 = sst [smem:[#allocation17_spill]] %s1246_s28  ;;  %s42_s15 = sadd.s32 1, %s1266_s10 }
  0x15   : > { %1702 = sst [smem:[#allocation18_spill]] %s1250_s29  ;;  %p40_p0 = scmp.ge.s32.totalorder %s39_s14, 8 }
  0x16   : > { %1703 = sst [smem:[#allocation19_spill]] %s1262_s9  ;;  %s131_s16 = sadd.s32 1, %s1250_s29 }
  0x17   : > { %1704 = sst [smem:[#allocation20_spill]] %s1266_s10  ;;  %p138_p1 = scmp.ne.s32.totalorder %s1250_s29, %s1246_s28 }
  0x18   : > { %1705 = sst [smem:[#allocation21_spill]] %s1270_s11  ;;  %p139_p2 = scmp.eq.s32.totalorder %s1270_s11, 0 }
  0x19   : > { %s1747_s14 = smov (%p40_p0, %s39_s14), 0  ;;  %s1749_s15 = smov (!%p40_p0, %s42_s15), %s1266_s10 }
  0x1a   : > { %1706 = sst [smem:[#allocation22_spill]] %s1747_s14  ;;  %p1390_p3 = por %p139_p2, %p138_p1 }
  0x1b   : > { %p144_p4 = scmp.ne.s32.totalorder %s1246_s28, %s1242_s27  ;;  %p44_p5 = scmp.ge.s32.totalorder %s1749_s15, 2 }
  0x1c   : > { %p145_p6 = scmp.eq.s32.totalorder %s875_s12, 0  ;;  %s207_s18 = ssub.s32 %s1262_s9, %s1747_s14 }
  0x1d   : > { %s211_s19 = sadd.s32 1, %s1238_s26  ;;  %s1751_s15 = smov (%p44_p5, %s1749_s15), 0 }
  0x1e   : > { %1708 = sst [smem:[#allocation23_spill]] %s1751_s15  ;;  %p1404_p7 = por %p145_p6, %p144_p4 }
  0x1f   : > { %p221_p8 = scmp.ne.s32.totalorder %s1238_s26, %s1234_s25  ;;  %s128_s21 = ssub.s32 %s1266_s10, %s1751_s15 }
  0x20   : > { %p222_p9 = scmp.eq.s32.totalorder %s875_s12, 15  ;;  %p129_p10 = scmp.eq.s32.totalorder %s128_s21, 0 }
  0x21   : > { %s208_s22 = sor.u32 %s207_s18, %s128_s21  ;;  %p227_p13 = scmp.ne.s32.totalorder %s1234_s25, %s1230_s24 }
  0x22   : > { %p209_p11 = scmp.eq.s32.totalorder %s208_s22, 0  ;;  %p1412_p12 = por %p222_p9, %p221_p8 }
  0x23   : > { %s1417_s14 = scalar_select %p129_p10, %s1250_s29, %s131_s16  }
  0x24   : > { %s1420_s9 = scalar_select %p209_p11, %s1238_s26, %s211_s19  }
  0x25   : > { %1711 = sst [smem:[#allocation24_spill]] %s1417_s14  ;;  %p228_p0 = scmp.eq.s32.totalorder %s876_s13, 15 }
  0x26   : > { %1712 = sst [smem:[#allocation25_spill]] %s1420_s9  ;;  %p1427_p2 = por %p222_p9, %p138_p1 }
  0x27   : > { %p1431_p5 = por %p228_p0, %p227_p13  ;;  %p1438_p6 = por %p228_p0, %p144_p4 }
  0x28   : > { %s1713_s15 = scalar_select %p1427_p2, 1, 0 }
  0x29   : > { %s1715_s12 = scalar_select %p1431_p5, 1, 0 }
  0x2a   : > { %1714 = sst [smem:[#allocation26_spill]] %s1713_s15  ;;  %p962_p8 = scmp.lt.s32.totalorder %s1270_s11, 16 }
  0x2b   : > { %1716 = sst [smem:[#allocation27_spill]] %s1715_s12  ;;  %s1444_s16 = sand.u32 1, %s1250_s29  }
  0x2c   : > { %s1717_s18 = scalar_select %p1438_p6, 1, 0 }
  0x2d   : > { %s1683_s13 = sshll.u32 %s1444_s16, 5  ;;  %s906_s19 = sshll.u32 %s1266_s10, 9 }
  0x2e   : > { %1718 = sst [smem:[#allocation28_spill]] %s1717_s18  ;;  %s307_s9 = scalar_lea.vmem [#allocation2], %s1683_s13 }
  0x2f   : > { %s1719_s3 = sld [smem:[#allocation30_spill]]  ;;  %s314_s26 = sshll.u32 %s307_s9, 4  ;;  %s315_s26 = int_to_ptr.vmem [resolvable:$true] %s314_s26 }
  0x30   : > { %p1457_p1 = pnand %p962_p8, %p1390_p3  ;;  %p885_p4 = scmp.ge.s32.totalorder %s1270_s11, 1 }
  0x31   : > { %s304_s29 = scalar_lea.sflag [#allocation3], %s1444_s16  ;;  %s1073_s27 = scalar_lea.vmem %s315_s26, 512 }
  0x32   : > { %p1062_p9 = pneg %p1457_p1  ;;  %p1074_p10 = scmp.ne.s32.totalorder %s315_s26, %s1073_s27 }
  0x33   : > { %s1272_s21 = smov [#allocation2]  }
  0x34   : > { %p1076_p11 = pnand %p1074_p10, %p1062_p9  ;;  %s1078_s9 = sshll.u32 %s1272_s21, 4  ;;  %s1079_s9 = int_to_ptr.vmem [resolvable:$false] %s1078_s9 }
  0x35   : > { %s313_s14 = scalar_lea.hbm %s1719_s3, %s906_s19  ;;  %s1080_s17 = scalar_lea.vmem %s1079_s9, 1024 }
  0x36   : > { %p1077_p13 = pneg %p1076_p11  ;;  %p1081_p3 = scmp.lt.s32.totalorder %s315_s26, %s1079_s9 }
  0x37   : > { %p1082_p0 = scmp.lt.s32.totalorder %s1080_s17, %s1073_s27 }
  0x39   : > { %p1083_p8 = por %p1082_p0, %p1081_p3 }
  0x3b   : > { %p1084_p6 = pnand %p1083_p8, %p1077_p13 }
  0x3d   : > { %1087 = shalt.err (!%p1084_p6)
}
  0x3e   : > { %s1273_s22 = smov 128   ;;  %s1274_s13 = smov 8  }
  0x3f   : > { %951 = dma.hbm_to_vmem [thread:$0]  (!%p1457_p1), %s313_s14, 512, %s315_s26, %s304_s29, %s1273_s22, %s1273_s22, %s1274_s13  }
  0x40   : > { %p349_p10 = scmp.lt.s32.totalorder %s1270_s11, 17  ;;  %s1721_s4 = sld [smem:[#allocation31_spill]] }
  0x41   : > { %s1723_s17 = sshll.u32 %s1444_s16, 5  ;;  %s325_s15 = scalar_lea.sflag [#allocation6], %s1444_s16 }
  0x42   : > { %p1478_p11 = pnand %p885_p4, %p349_p10  ;;  %s328_s12 = scalar_lea.vmem [#allocation5], %s1723_s17 }
  0x43   : > { %s335_s24 = sshll.u32 %s328_s12, 4  ;;  %s1275_s26 = smov [#allocation5]   ;;  %s336_s24 = int_to_ptr.vmem [resolvable:$true] %s335_s24 }
  0x44   : > { %s1101_s7 = scalar_lea.vmem %s336_s24, 512  ;;  %s1106_s29 = sshll.u32 %s1275_s26, 4  ;;  %s1107_s29 = int_to_ptr.vmem [resolvable:$false] %s1106_s29 }
  0x45   : > { %p1102_p6 = scmp.ne.s32.totalorder %s336_s24, %s1101_s7  ;;  %s1108_s3 = scalar_lea.vmem %s1107_s29, 1024 }
  0x46   : > { %s334_s27 = scalar_lea.hbm %s1721_s4, %s906_s19  ;;  %p1109_p0 = scmp.lt.s32.totalorder %s336_s24, %s1107_s29 }
  0x47   : > { %p1104_p13 = pnand %p1102_p6, %p1062_p9  ;;  %p1110_p4 = scmp.lt.s32.totalorder %s1108_s3, %s1101_s7 }
  0x49   : > { %p1105_p3 = pneg %p1104_p13  ;;  %p1111_p8 = por %p1110_p4, %p1109_p0 }
  0x4b   : > { %p1112_p10 = pnand %p1111_p8, %p1105_p3 }
  0x4d   : > { %1115 = shalt.err (!%p1112_p10)
}
  0x4e   : > { %954 = dma.hbm_to_vmem [thread:$0]  (!%p1457_p1), %s334_s27, 512, %s336_s24, %s325_s15, %s1273_s22, %s1273_s22, %s1274_s13  }
  0x4f   : > { %353 = sbr.rel (%p1478_p11) target bundleno = 367 (0x16f), region = 44 }
  0x54   : > { %s1493_s14 = sand.u32 1, %s1246_s28  }
  0x55   : > { %1724 = sst [smem:[#allocation29_spill]] %s1493_s14  ;;  %s886_s12 = sshll.u32 %s1493_s14, 5 }
  0x56   : > { %s356_s16 = scalar_lea.sflag [#allocation3], %s1493_s14  ;;  %s1497_s19 = scalar_lea.vmem [#allocation2], %s886_s12 }
  0x57   : > { %1213 = dma.done.wait (%p1404_p7), %s356_s16, 512  }
  0x58   : > { %1215 = vsyncadd (%p1404_p7), %s356_s16, 4294966784  ;;  %s365_s7 = scalar_lea.sflag [#allocation6], %s1493_s14  ;;  %s1504_s24 = scalar_lea.vmem [#allocation5], %s886_s12 }
  0x59   : > { %1217 = dma.done.wait (%p1404_p7), %s365_s7, 512  }
  0x5a   : > { %1219 = vsyncadd (%p1404_p7), %s365_s7, 4294966784  ;;  %s1689_s15 = sand.u32 1, %s1234_s25   ;;  %s889_s18 = sshll.u32 %s1493_s14, 1 }
  0x5b   : > { %s1514_s13 = sshll.u32 %s1689_s15, 1  ;;  %p432_p1 = scmp.lt.s32.totalorder %s1258_s8, 1 }
  0x5c   : > { %p434_p9 = scmp.lt.s32.totalorder %s1254_s30, 7  ;;  %p895_p7 = scmp.ne.s32.totalorder %s1254_s30, 0 }
  0x5d   : > { %s1519_s22 = scalar_select %p432_p1, %s1258_s8, 1 }
  0x5e   : > { %s435_s20 = scalar_select %p434_p9, %s1254_s30, 7 }
  0x5f   : > { %s890_s21 = sshll.u32 %s1519_s22, 3  ;;  %s894_s27 = sshll.u32 %s1519_s22, 1 }
  0x60   : > { %s437_s9 = sadd.s32 %s890_s21, %s435_s20  ;;  %s451_s29 = scalar_lea.vmem %s1670_s2, %s894_s27 }
  0x61   : > { %s891_s3 = sshll.u32 %s437_s9, 1  ;;  %s454_s7 = scalar_lea.vmem %s1673_s5, %s1519_s22 }
  0x62   : > { %s1534_s10 = scalar_lea.vmem %s1668_s0, %s891_s3  ;;  %s1539_s14 = scalar_lea.vmem %s1669_s1, %s891_s3 }
  0x63   : > { %s424_s20 = scalar_lea.vmem [#allocation7], %s1514_s13  ;;  %s1542_s21 = scalar_lea.vmem [#allocation8], %s889_s18 }
  0x64   : > { %458 = sbr.rel (%p895_p7) target bundleno = 107 (0x6b), region = 56 }
  0x69   : > { %v459_v0 = vld [vmem:[%s451_s29] sm:$0x3]  ;;  %vm460_vm0 = vcmask 254976  }
  0x6a   : > { %461 = vst.msk [vmem:[%s1542_s21] sm:$0x3] %vm460_vm0, %v459_v0 }
  0x6b PF: > { %v472_v1 = vld [vmem:[%s1504_s24 + $0x18] sm:$0xff]  ;;  %v1276_v3 = vmov 0.0   ;;  %v471_v4 = vld [vmem:[%s1504_s24 + $0x10] sm:$0xff]  ;;  %v470_v6 = vld [vmem:[%s1504_s24 + $0x8] sm:$0xff]  ;;  %vm473_vm1 = vcmask 261120   ;;  %vm1277_vm2 = vmmov 0  }
  0x6c   : > { %v468_v2 = vld [vmem:[%s1497_s19 + $0x18] sm:$0xff]  ;;  %918 = vmatprep.subr.mxu0 %v1276_v3  ;;  %929 = vmatprep.subr.mxu1 %v1276_v3  ;;  %v467_v5 = vld [vmem:[%s1497_s19 + $0x10] sm:$0xff]  ;;  %v466_v7 = vld [vmem:[%s1497_s19 + $0x8] sm:$0xff]  ;;  %v1278_v13 = vmov 0   ;;  %s680_s15 = sshll.u32 %s1542_s21, 4  ;;  %vm643_vm3 = vcmask 254976   ;;  %s1580_s15 = int_to_ptr.vmem [resolvable:$true] %s680_s15 }
  0x6d   : > { %919 = vmatpush3.msra.mxu0 %v472_v1  ;;  %930 = vmatpush3.msra.mxu1 %v468_v2  ;;  %v469_v8 = vld [vmem:[%s1504_s24] sm:$0xff]  ;;  %s903_s24 = sshll.u32 %s1258_s8, 5  ;;  %s1725_s17 = sld [smem:[#allocation32_spill]] }
  0x6e   : > { %920 = vmatprep.subr.mxu0 %v1276_v3  ;;  %931 = vmatprep.subr.mxu1 %v1276_v3  ;;  %v465_v9 = vld [vmem:[%s1497_s19] sm:$0xff]  ;;  %s667_s19 = sshll.u32 %s424_s20, 4  ;;  %s1279_s12 = smov [#allocation7]   ;;  %s1573_s19 = int_to_ptr.vmem [resolvable:$true] %s667_s19 }
  0x6f   : > { %921 = vmatpush3.msra.mxu0 %v471_v4  ;;  %932 = vmatpush3.msra.mxu1 %v467_v5  ;;  %v463_v11 = vld [vmem:[%s1534_s10] sm:$0x3]  ;;  %s901_s10 = sshll.u32 %s1258_s8, 3  ;;  %s1726_s8 = sand.u32 1, %s1234_s25  }
  0x70   : > { %922 = vmatprep.subr.mxu0 %v1276_v3  ;;  %933 = vmatprep.subr.mxu1 %v1276_v3  ;;  %v464_v12 = vld [vmem:[%s1539_s14] sm:$0x3]  ;;  %s663_s11 = sadd.s32 %s1254_s30, %s901_s10  ;;  %s647_s29 = scalar_lea.sflag [#allocation4], %s1726_s8 }
  0x71   : > { %923 = vmatpush3.msra.mxu0 %v470_v6  ;;  %934 = vmatpush3.msra.mxu1 %v466_v7  ;;  %v462_v10 = vld [vmem:[%s1542_s21] sm:$0x3]  ;;  %v635_v14 = vsub.f32 1.0, %v464_v12  ;;  %v898_v17 = vld [vmem:[%s454_s7] ss:$0 sm:$0xff]  ;;  %s902_s14 = sshll.u32 %s663_s11, 5 }
  0x72   : > { %924 = vmatprep.subr.mxu0 %v1276_v3  ;;  %935 = vmatprep.subr.mxu1 %v1276_v3  ;;  %s1571_s27 = scalar_lea.hbm %s1674_s6, %s902_s14  ;;  %s1116_s3 = scalar_lea.vmem %s1573_s19, 32 }
  0x73   : > { %925 = vmatpush3.msra.mxu0 %v469_v8  ;;  %926 = vmatprep.mubr.msk.f32.mxu0 %vm1277_vm2, %v1276_v3  ;;  %s1578_s26 = scalar_lea.hbm %s1725_s17, %s903_s24  ;;  %p1117_p11 = scmp.ne.s32.totalorder %s1573_s19, %s1116_s3 }
  0x74   : > { %936 = vmatpush3.msra.mxu1 %v465_v9  ;;  %937 = vmatprep.mubr.msk.f32.mxu1 %vm1277_vm2, %v1276_v3  ;;  %s1120_s16 = sshll.u32 %s1279_s12, 4  ;;  %s1121_s16 = int_to_ptr.vmem [resolvable:$false] %s1120_s16 }
  0x75   : > { %927 = vmatmul.mubr.msk.f32.vlgmr.msra.gmra.mxu0 %vm473_vm1, %v462_v10  ;;  %938 = vmatmul.mubr.msk.f32.vlgmr.msra.gmra.mxu1 %vm473_vm1, %v463_v11  ;;  %p1118_p6 = pnand %p1117_p11, %p1412_p12  ;;  %s1122_s7 = scalar_lea.vmem %s1121_s16, 64 }
  0x76   : > { %1057 = vset.pattern.permute.xlu0 %v1278_v13  ;;  %p1123_p3 = scmp.lt.s32.totalorder %s1573_s19, %s1121_s16  ;;  %p1124_p0 = scmp.lt.s32.totalorder %s1122_s7, %s1116_s3 }
  0x77   : > { %631 = vperm.xlu0 %1057, %v464_v12   ;;  %p1119_p13 = pneg %p1118_p6 }
  0x78   : > { %p1125_p4 = por %p1124_p0, %p1123_p3 }
  0x7a   : > { %p1126_p8 = pnand %p1125_p4, %p1119_p13 }
  0x7b   : > { %638 = vperm.xlu0 %1057, %v635_v14  }
  0xf2   : > { %v632_v22 = vpop.permute.xlu0 %631 }
  0xf6   : > { %v639_v23 = vpop.permute.xlu0 %638 }
  0xf7   : > { %v641_v26 = vmul.f32 %v639_v23, %v462_v10 }
 0x135   : > { %v543_v15 = vpop.f32.mrf.mxu0  ;;  %v616_v16 = vpop.f32.mrf.mxu1 }
 0x136   : > { %v617_v18 = vadd.f32 %v616_v16, %v543_v15 }
 0x137   : > { %v928_v19 = vpop.f32.mrf.mxu0  ;;  %v939_v20 = vpop.f32.mrf.mxu1 }
 0x138   : > { %v627_v21 = vadd.f32 %v898_v17, %v617_v18 }
 0x13a   : > { %1058 = vtanh.f32 %v627_v21 }
 0x147   : > { %v1059_v24 = vpop.eup %1058 }
 0x148   : > { %v634_v25 = vmul.f32 %v1059_v24, %v632_v22 }
 0x14a   : > { %v642_v27 = vadd.f32 %v641_v26, %v634_v25 }
 0x14c   : > { %644 = vst.msk [vmem:[%s424_s20] sm:$0x3] %vm643_vm3, %v642_v27  ;;  %645 = vst.msk [vmem:[%s1542_s21] sm:$0x3] %vm643_vm3, %v642_v27 }
 0x14d   : > { %1129 = shalt.err (!%p1126_p8)
}
 0x14e   : > { %s1130_s13 = scalar_lea.hbm %s1571_s27, 32  ;;  %s1134_s4 = scalar_lea.hbm %s1674_s6, 512 }
 0x14f   : > { %p1131_p10 = scmp.ne.s32.totalorder %s1571_s27, %s1130_s13  ;;  %p1135_p7 = scmp.lt.s32.totalorder %s1571_s27, %s1674_s6 }
 0x150   : > { %p1136_p11 = scmp.lt.s32.totalorder %s1134_s4, %s1130_s13 }
 0x151   : > { %p1132_p1 = pnand %p1131_p10, %p1412_p12 }
 0x152   : > { %p1137_p6 = por %p1136_p11, %p1135_p7 }
 0x153   : > { %p1133_p9 = pneg %p1132_p1 }
 0x155   : > { %p1138_p13 = pnand %p1137_p6, %p1133_p9 }
 0x157   : > { %1141 = shalt.err (!%p1138_p13)
}
 0x158   : > { %s1727_s11 = sld [smem:[#allocation29_spill]]  ;;  %s1142_s18 = scalar_lea.vmem %s1580_s15, 32 }
 0x159   : > { %944 = dma.vmem_to_hbm [thread:$0]  (%p1412_p12), %s1573_s19, 32, %s1571_s27, %s647_s29  }
 0x15a   : > { %p1143_p3 = scmp.ne.s32.totalorder %s1580_s15, %s1142_s18  ;;  %s1280_s22 = smov [#allocation8]  }
 0x15b   : > { %s1146_s30 = sshll.u32 %s1280_s22, 4  ;;  %s1147_s30 = int_to_ptr.vmem [resolvable:$false] %s1146_s30 }
 0x15c   : > { %p1144_p0 = pnand %p1143_p3, %p1427_p2  ;;  %s1148_s9 = scalar_lea.vmem %s1147_s30, 64 }
 0x15d   : > { %p1149_p8 = scmp.lt.s32.totalorder %s1580_s15, %s1147_s30  ;;  %p1150_p10 = scmp.lt.s32.totalorder %s1148_s9, %s1142_s18 }
 0x15e   : > { %s652_s24 = scalar_lea.sflag [#allocation9], %s1727_s11  ;;  %p1145_p4 = pneg %p1144_p0 }
 0x15f   : > { %p1151_p1 = por %p1150_p10, %p1149_p8 }
 0x161   : > { %p1152_p9 = pnand %p1151_p1, %p1145_p4 }
 0x163   : > { %1155 = shalt.err (!%p1152_p9)
}
 0x164   : > { %s1156_s23 = scalar_lea.hbm %s1578_s26, 32  ;;  %s1160_s8 = scalar_lea.hbm %s1725_s17, 64 }
 0x165   : > { %p1157_p12 = scmp.ne.s32.totalorder %s1578_s26, %s1156_s23  ;;  %p1161_p6 = scmp.lt.s32.totalorder %s1578_s26, %s1725_s17 }
 0x166   : > { %p1162_p13 = scmp.lt.s32.totalorder %s1160_s8, %s1156_s23 }
 0x167   : > { %p1158_p7 = pnand %p1157_p12, %p1427_p2 }
 0x168   : > { %p1163_p3 = por %p1162_p13, %p1161_p6 }
 0x169   : > { %p1159_p11 = pneg %p1158_p7 }
 0x16b   : > { %p1164_p0 = pnand %p1163_p3, %p1159_p11 }
 0x16d   : > { %1167 = shalt.err (!%p1164_p0)
}
 0x16e   : > { %945 = dma.vmem_to_hbm [thread:$0]  (%p1427_p2), %s1580_s15, 32, %s1578_s26, %s652_s24  }
 0x16f PF: > { %s1729_s12 = sld [smem:[#allocation21_spill]] }
 0x170   : > { %s1730_s16 = sld [smem:[#allocation14_spill]] }
 0x175   : > { %p963_p4 = scmp.ge.s32.totalorder %s1729_s12, 2 }
 0x176   : > { %s692_s13 = sand.u32 1, %s1730_s16  }
 0x177   : > { %p956_p8 = pnand %p963_p4, %p1431_p5  ;;  %s693_s20 = scalar_lea.sflag [#allocation4], %s692_s13 }
 0x179   : > { %p957_p10 = pneg %p956_p8 }
 0x17b   : > { %1221 = dma.done.wait (%p957_p10), %s693_s20, 32  }
 0x17c   : > { %1223 = vsyncadd (%p957_p10), %s693_s20, 4294967264  ;;  %s1732_s21 = sld [smem:[#allocation16_spill]] }
 0x17d   : > { %s1733_s4 = sld [smem:[#allocation28_spill]] }
 0x182   : > { %s701_s28 = sand.u32 1, %s1732_s21  }
 0x183   : > { %p1734_p1 = scmp.ne.s32.totalorder %s1733_s4, 0  ;;  %s702_s10 = scalar_lea.sflag [#allocation9], %s701_s28 }
 0x185   : > { %p959_p9 = pnand %p963_p4, %p1734_p1 }
 0x187   : > { %p960_p12 = pneg %p959_p9 }
 0x189   : > { %1225 = dma.done.wait (%p960_p12), %s702_s10, 32  }
 0x18a   : > { %1227 = vsyncadd (%p960_p12), %s702_s10, 4294967264  ;;  %s30_s11 = sadd.s32 1, %s1729_s12   ;;  %s1735_s15 = sld [smem:[#allocation15_spill]] }
 0x18b   : > { %p27_p2 = scmp.ge.s32.totalorder %s30_s11, 18   ;;  %s1736_s26 = sld [smem:[#allocation25_spill]] }
 0x18c   : > { %s1737_s27 = sld [smem:[#allocation17_spill]]  ;;  %s1744_s24 = smov %s1234_s25 }
 0x18d   : > { %s1738_s28 = sld [smem:[#allocation18_spill]] }
 0x18e   : > { %s1739_s29 = sld [smem:[#allocation24_spill]]  ;;  %29 = sbr.rel (!%p27_p2) target bundleno = 17 (0x11), region = 135 }
 0x18f   : > { %s1740_s30 = sld [smem:[#allocation19_spill]] }
 0x190   : > { %s1741_s8 = sld [smem:[#allocation20_spill]]  ;;  %s1745_s25 = smov %s1735_s15 }
 0x191   : > { %s1742_s9 = sld [smem:[#allocation22_spill]] }
 0x192   : > { %s1743_s10 = sld [smem:[#allocation23_spill]] }
 0x193   :  { %707 = vsyncpa [#allocation3], 1 }
 0x194   :  { %709 = vsyncpa [#allocation3 + $0x1], 1 }
 0x195   :  { %710 = vsyncpa [#allocation6], 1 }
 0x196   :  { %712 = vsyncpa [#allocation6 + $0x1], 1 }
 0x197   :  { %713 = vsyncpa [#allocation4], 1 }
 0x198   :  { %715 = vsyncpa [#allocation4 + $0x1], 1 }
 0x199   :  { %716 = vsyncpa [#allocation9], 1 }
 0x19a   :  { %718 = vsyncpa [#allocation9 + $0x1], 1 }

</bundles_post_ra>
